<compile_context>
chip_gen: v5e
topology: v5e:2x2
jax: 0.10.0
libtpu: 0.0.40
codegen_flags: <defaults>
</compile_context>

<pallas_src>
import jax
import jax.numpy as jnp
from jax.experimental import pallas as pl
from jax.experimental.pallas import tpu as pltpu

_F32_SUBLANE = 8  # f32 sublane granularity for batch-tile alignment


def _round_up(x, m):
    return (x + m - 1) // m * m


def _default_tile_b(b_total):
    """Batch-tile heuristic.

    Per-step VMEM footprint is tiny (~1 MB double-buffered at tile_b=2048), so
    use large tiles everywhere, but guarantee >= 4 grid steps when there is
    enough work so that on v7x each TensorCore of the "parallel" batch axis gets
    >= 2 steps and its own load/compute/store pipeline stays double-buffered.
    """
    tile = 2048
    min_steps = 4
    if b_total >= min_steps * _F32_SUBLANE:
        tile = min(tile, _round_up(pl.cdiv(b_total, min_steps), _F32_SUBLANE))
    else:
        tile = min(tile, _round_up(max(b_total, 1), _F32_SUBLANE))
    return tile


def _mlp_kernel(x_ref, w1_ref, b1_ref, w2_ref, b2_ref, w3_ref, b3_ref, o_ref):
    # Layer 1: cast x to bf16 in-kernel (no wrapper-side padded copy of x).
    # (tile_b, in_dim) @ (in_dim, H) -> f32 accum, + bias (f32), ReLU (f32).
    x = x_ref[...].astype(w1_ref.dtype)
    h1 = jnp.dot(x, w1_ref[...], preferred_element_type=jnp.float32)
    h1 = jnp.maximum(h1 + b1_ref[...], 0.0)
    # Layer 2: (tile_b, H) @ (H, H) -> f32 accum, + bias, ReLU.
    h2 = jnp.dot(h1.astype(w2_ref.dtype), w2_ref[...],
                 preferred_element_type=jnp.float32)
    h2 = jnp.maximum(h2 + b2_ref[...], 0.0)
    # Layer 3: compact (tile_b, out_dim) result; masked in-core stores are far
    # cheaper than 64x padded HBM writeback.
    out = jnp.dot(h2.astype(w3_ref.dtype), w3_ref[...],
                  preferred_element_type=jnp.float32) + b3_ref[...]
    o_ref[...] = out.astype(o_ref.dtype)


def _jnp_forward(x, p):
    h1 = jnp.maximum(x @ p["w1"] + p["b1"], 0.0)
    h2 = jnp.maximum(h1 @ p["w2"] + p["b2"], 0.0)
    return h2 @ p["w3"] + p["b3"]


def diffusion_network_forward(x, params, *, tile_b=None,
                              compute_dtype=jnp.bfloat16,
                              min_batch_for_pallas=4096,
                              force_pallas=False):
    """3-layer MLP forward pass. Uses a single Pallas kernel above a batch
    threshold (or when force_pallas=True); otherwise falls back to fused jnp.
    The threshold should be re-checked per generation (higher HBM bandwidth on
    v7x moves the crossover to larger B)."""
    w1, b1 = params["w1"], params["b1"]
    w2, b2 = params["w2"], params["b2"]
    w3, b3 = params["w3"], params["b3"]

    B, in_dim = x.shape
    hidden = w1.shape[1]
    out_dim = w3.shape[1]

    if not force_pallas and B < min_batch_for_pallas:
        # Tiny problems: kernel launch + a 1-2 step grid is pure overhead.
        return _jnp_forward(x, params)

    if tile_b is None:
        tile_b = _default_tile_b(B)
    tile_b = max(_F32_SUBLANE,
                 _round_up(min(tile_b, _round_up(B, _F32_SUBLANE)), _F32_SUBLANE))
    n_tiles = pl.cdiv(B, tile_b)  # partial trailing block is handled by Pallas

    # Weights to bf16 for the MXU; biases stay f32 (bias add / ReLU in f32).
    w1p = w1.astype(compute_dtype)   # (in_dim, hidden)
    w2p = w2.astype(compute_dtype)   # (hidden, hidden)
    w3p = w3.astype(compute_dtype)   # (hidden, out_dim)
    b1p = b1.astype(jnp.float32)
    b2p = b2.astype(jnp.float32)
    b3p = b3.astype(jnp.float32)

    def rep(shape):  # full-array block, resident across all batch tiles
        return pl.BlockSpec(shape, lambda i: (0, 0))

    w_itemsize = jnp.dtype(compute_dtype).itemsize
    flops = 2 * B * (in_dim * hidden + hidden * hidden + hidden * out_dim)
    bytes_accessed = (
        B * in_dim * x.dtype.itemsize                                  # x (f32)
        + (in_dim * hidden + hidden * hidden + hidden * out_dim) * w_itemsize
        + (2 * hidden + out_dim) * 4                                   # biases
        + B * out_dim * x.dtype.itemsize                               # output
    )

    out = pl.pallas_call(
        _mlp_kernel,
        out_shape=jax.ShapeDtypeStruct((B, out_dim), x.dtype),
        grid_spec=pl.GridSpec(
            grid=(n_tiles,),
            in_specs=[
                # x batch tile; last dim == full array dim (unpadded input).
                pl.BlockSpec((tile_b, in_dim), lambda i: (i, 0)),
                rep(w1p.shape), rep(b1p.shape),
                rep(w2p.shape), rep(b2p.shape),
                rep(w3p.shape), rep(b3p.shape),
            ],
            # Compact output block; last dim == full array dim (no lane padding).
            out_specs=pl.BlockSpec((tile_b, out_dim), lambda i: (i, 0)),
        ),
        compiler_params=pltpu.CompilerParams(
            dimension_semantics=("parallel",),
        ),
        cost_estimate=pl.CostEstimate(
            flops=flops, transcendentals=0, bytes_accessed=bytes_accessed),
    )(x, w1p, b1p, w2p, b2p, w3p, b3p)

    return out


def init_params(key, input_dim, hidden_dim, output_dim):
    """Deterministic parameter init (uniform, PyTorch-Linear-style bounds)."""
    ks = jax.random.split(key, 6)

    def linear(kw, kb, fan_in, fan_out):
        bound = 1.0 / jnp.sqrt(jnp.float32(fan_in))
        w = jax.random.uniform(kw, (fan_in, fan_out), jnp.float32, -bound, bound)
        b = jax.random.uniform(kb, (1, fan_out), jnp.float32, -bound, bound)
        return w, b

    w1, b1 = linear(ks[0], ks[1], input_dim, hidden_dim)
    w2, b2 = linear(ks[2], ks[3], hidden_dim, hidden_dim)
    w3, b3 = linear(ks[4], ks[5], hidden_dim, output_dim)
    return {"w1": w1, "b1": b1, "w2": w2, "b2": b2, "w3": w3, "b3": b3}


if __name__ == "__main__":
    # Small shapes consistent with the module: input_dim=3, hidden_dim=32,
    # output_dim=2; batch=256 with tile_b=64 -> a 4-step "parallel" grid so
    # per-core double-buffering (and v7x dual-TC sharding, 2 steps/core) is
    # actually exercised.
    B, INPUT_DIM, HIDDEN_DIM, OUTPUT_DIM = 256, 3, 32, 2

    key = jax.random.PRNGKey(0)
    kx, kp = jax.random.split(key)
    x = jax.random.normal(kx, (B, INPUT_DIM), dtype=jnp.float32)
    params = init_params(kp, INPUT_DIM, HIDDEN_DIM, OUTPUT_DIM)

    out = diffusion_network_forward(x, params, tile_b=64, force_pallas=True)
    out = jax.block_until_ready(out)

    ref = _jnp_forward(x, params)  # f32 reference (module semantics)
    assert out.shape == (B, OUTPUT_DIM), out.shape
    # bf16 MXU compute with f32 accumulation -> loose-but-tight-enough tolerance.
    assert jnp.allclose(out, ref, atol=5e-2, rtol=5e-2), \
        f"mismatch vs JAX reference, max err {jnp.max(jnp.abs(out - ref))}"

    print("KERNEL_OK")
</pallas_src>

<mosaic_0001>
module attributes {stable_mosaic.version = 11 : i64} {
  func.func @_mlp_kernel(%arg0: i32, %arg1: memref<64x3xf32, #tpu.memory_space<vmem>>, %arg2: memref<3x32xbf16, #tpu.memory_space<vmem>>, %arg3: memref<1x32xf32, #tpu.memory_space<vmem>>, %arg4: memref<32x32xbf16, #tpu.memory_space<vmem>>, %arg5: memref<1x32xf32, #tpu.memory_space<vmem>>, %arg6: memref<32x2xbf16, #tpu.memory_space<vmem>>, %arg7: memref<1x2xf32, #tpu.memory_space<vmem>>, %arg8: memref<64x2xf32, #tpu.memory_space<vmem>>) attributes {dimension_semantics = [#tpu.dimension_semantics<parallel>], iteration_bounds = array<i64: 4>, scalar_prefetch = 0 : i64, scratch_operands = 0 : i64, tpu.core_type = #tpu.core_type<tc>, window_params = [{transform_indices = @transform_0, window_bounds = array<i64: 64, 3>}, {pipeline_mode = #tpu.pipeline_mode<synchronous>, transform_indices = @transform_1, window_bounds = array<i64: 3, 32>}, {pipeline_mode = #tpu.pipeline_mode<synchronous>, transform_indices = @transform_2, window_bounds = array<i64: 1, 32>}, {pipeline_mode = #tpu.pipeline_mode<synchronous>, transform_indices = @transform_3, window_bounds = array<i64: 32, 32>}, {pipeline_mode = #tpu.pipeline_mode<synchronous>, transform_indices = @transform_4, window_bounds = array<i64: 1, 32>}, {pipeline_mode = #tpu.pipeline_mode<synchronous>, transform_indices = @transform_5, window_bounds = array<i64: 32, 2>}, {pipeline_mode = #tpu.pipeline_mode<synchronous>, transform_indices = @transform_6, window_bounds = array<i64: 1, 2>}, {transform_indices = @transform_7, window_bounds = array<i64: 64, 2>}]} {
    %c0 = arith.constant 0 : index
    %c0_0 = arith.constant 0 : index
    %0 = vector.load %arg1[%c0, %c0_0] : memref<64x3xf32, #tpu.memory_space<vmem>>, vector<64x3xf32>
    %1 = arith.truncf %0 : vector<64x3xf32> to vector<64x3xbf16>
    %c0_1 = arith.constant 0 : index
    %c0_2 = arith.constant 0 : index
    %2 = vector.load %arg2[%c0_1, %c0_2] : memref<3x32xbf16, #tpu.memory_space<vmem>>, vector<3x32xbf16>
    %cst = arith.constant dense<0.000000e+00> : vector<64x32xf32>
    %3 = tpu.matmul %1, %2, %cst {dimension_numbers = #tpu.dot_dimension_numbers<[1], [0], [0], [1], [0, 0, 1, 1], [], []>} : vector<64x3xbf16>, vector<3x32xbf16>, vector<64x32xf32> -> vector<64x32xf32>
    %c0_3 = arith.constant 0 : index
    %c0_4 = arith.constant 0 : index
    %4 = vector.load %arg3[%c0_3, %c0_4] : memref<1x32xf32, #tpu.memory_space<vmem>>, vector<1x32xf32>
    %5 = vector.broadcast %4 : vector<1x32xf32> to vector<64x32xf32>
    %6 = arith.addf %3, %5 : vector<64x32xf32>
    %cst_5 = arith.constant 0.000000e+00 : f32
    %7 = vector.broadcast %cst_5 : f32 to vector<64x32xf32>
    %8 = arith.maximumf %6, %7 : vector<64x32xf32>
    %9 = arith.truncf %8 : vector<64x32xf32> to vector<64x32xbf16>
    %c0_6 = arith.constant 0 : index
    %c0_7 = arith.constant 0 : index
    %10 = vector.load %arg4[%c0_6, %c0_7] : memref<32x32xbf16, #tpu.memory_space<vmem>>, vector<32x32xbf16>
    %cst_8 = arith.constant dense<0.000000e+00> : vector<64x32xf32>
    %11 = tpu.matmul %9, %10, %cst_8 {dimension_numbers = #tpu.dot_dimension_numbers<[1], [0], [0], [1], [0, 0, 1, 1], [], []>} : vector<64x32xbf16>, vector<32x32xbf16>, vector<64x32xf32> -> vector<64x32xf32>
    %c0_9 = arith.constant 0 : index
    %c0_10 = arith.constant 0 : index
    %12 = vector.load %arg5[%c0_9, %c0_10] : memref<1x32xf32, #tpu.memory_space<vmem>>, vector<1x32xf32>
    %13 = vector.broadcast %12 : vector<1x32xf32> to vector<64x32xf32>
    %14 = arith.addf %11, %13 : vector<64x32xf32>
    %cst_11 = arith.constant 0.000000e+00 : f32
    %15 = vector.broadcast %cst_11 : f32 to vector<64x32xf32>
    %16 = arith.maximumf %14, %15 : vector<64x32xf32>
    %17 = arith.truncf %16 : vector<64x32xf32> to vector<64x32xbf16>
    %c0_12 = arith.constant 0 : index
    %c0_13 = arith.constant 0 : index
    %18 = vector.load %arg6[%c0_12, %c0_13] : memref<32x2xbf16, #tpu.memory_space<vmem>>, vector<32x2xbf16>
    %cst_14 = arith.constant dense<0.000000e+00> : vector<64x2xf32>
    %19 = tpu.matmul %17, %18, %cst_14 {dimension_numbers = #tpu.dot_dimension_numbers<[1], [0], [0], [1], [0, 0, 1, 1], [], []>} : vector<64x32xbf16>, vector<32x2xbf16>, vector<64x2xf32> -> vector<64x2xf32>
    %c0_15 = arith.constant 0 : index
    %c0_16 = arith.constant 0 : index
    %20 = vector.load %arg7[%c0_15, %c0_16] : memref<1x2xf32, #tpu.memory_space<vmem>>, vector<1x2xf32>
    %21 = vector.broadcast %20 : vector<1x2xf32> to vector<64x2xf32>
    %22 = arith.addf %19, %21 : vector<64x2xf32>
    %c0_17 = arith.constant 0 : index
    %c0_18 = arith.constant 0 : index
    %23 = vector.load %arg8[%c0_17, %c0_18] : memref<64x2xf32, #tpu.memory_space<vmem>>, vector<64x2xf32>
    tpu.vector_store %arg8[%c0_17, %c0_18], %22 {strides = array<i32>} : memref<64x2xf32, #tpu.memory_space<vmem>>, vector<64x2xf32>,
    return
  }
  func.func @transform_0(%arg0: i32) -> (i32, i32) {
    %c0_i32 = arith.constant 0 : i32
    %c0_i32_0 = arith.constant 0 : i32
    return %arg0, %c0_i32 : i32, i32
  }
  func.func @transform_1(%arg0: i32) -> (i32, i32) {
    %c0_i32 = arith.constant 0 : i32
    %c0_i32_0 = arith.constant 0 : i32
    %c0_i32_1 = arith.constant 0 : i32
    return %c0_i32, %c0_i32_0 : i32, i32
  }
  func.func @transform_2(%arg0: i32) -> (i32, i32) {
    %c0_i32 = arith.constant 0 : i32
    %c0_i32_0 = arith.constant 0 : i32
    %c0_i32_1 = arith.constant 0 : i32
    return %c0_i32, %c0_i32_0 : i32, i32
  }
  func.func @transform_3(%arg0: i32) -> (i32, i32) {
    %c0_i32 = arith.constant 0 : i32
    %c0_i32_0 = arith.constant 0 : i32
    %c0_i32_1 = arith.constant 0 : i32
    return %c0_i32, %c0_i32_0 : i32, i32
  }
  func.func @transform_4(%arg0: i32) -> (i32, i32) {
    %c0_i32 = arith.constant 0 : i32
    %c0_i32_0 = arith.constant 0 : i32
    %c0_i32_1 = arith.constant 0 : i32
    return %c0_i32, %c0_i32_0 : i32, i32
  }
  func.func @transform_5(%arg0: i32) -> (i32, i32) {
    %c0_i32 = arith.constant 0 : i32
    %c0_i32_0 = arith.constant 0 : i32
    %c0_i32_1 = arith.constant 0 : i32
    return %c0_i32, %c0_i32_0 : i32, i32
  }
  func.func @transform_6(%arg0: i32) -> (i32, i32) {
    %c0_i32 = arith.constant 0 : i32
    %c0_i32_0 = arith.constant 0 : i32
    %c0_i32_1 = arith.constant 0 : i32
    return %c0_i32, %c0_i32_0 : i32, i32
  }
  func.func @transform_7(%arg0: i32) -> (i32, i32) {
    %c0_i32 = arith.constant 0 : i32
    %c0_i32_0 = arith.constant 0 : i32
    return %arg0, %c0_i32 : i32, i32
  }
}

</mosaic_0001>

<bundles_post_ra>
// kernel: tpu_custom_call.1
= control target key start
LH: loop header
LB: loop body
LE: loop exit
PB: predicated region body
PF: predicated region fallthrough
CT: control target
= control target key end

     0   :  { %s669_s24 = smov 0   ;;  %s733_s0 = inlined_call_operand.vmem [shape: f32[256,3], index: 0, kind: input, shape index: {}]   ;;  %s734_s1 = inlined_call_operand.vmem [shape: bf16[3,32], index: 1, kind: input, shape index: {}]   ;;  %s735_s2 = inlined_call_operand.vmem [shape: f32[1,32], index: 2, kind: input, shape index: {}]   ;;  %s736_s3 = inlined_call_operand.vmem [shape: bf16[32,32], index: 3, kind: input, shape index: {}]   ;;  %s737_s4 = inlined_call_operand.vmem [shape: f32[1,32], index: 4, kind: input, shape index: {}]   ;;  %s738_s5 = inlined_call_operand.vmem [shape: bf16[32,2], index: 5, kind: input, shape index: {}]   ;;  %s739_s6 = inlined_call_operand.vmem [shape: f32[1,2], index: 6, kind: input, shape index: {}]   ;;  %s740_s7 = inlined_call_operand.vmem [shape: f32[256,2], index: 7, kind: output, shape index: {}]  }
   0x1 LB: > { %s561_s25 = sadd.s32 4294967295, %s626_s24   ;;  %p565_p0 = scmp.ge.s32.totalorder %s626_s24, 1  ;;  %s626_s24 = sphi %s669_s24, %s17_s24  }
   0x2   : > { %p238_p1 = scmp.lt.s32.totalorder %s626_s24, 5 }
   0x4   : > { %p239_p2 = pnand %p565_p0, %p238_p1 }
   0x5   : > { %s566_s28 = sshll.u32 (!%p239_p2), %s561_s25, 3 }
   0x6   : > { %242 = sbr.rel (%p239_p2) target bundleno = 496 (0x1f0), region = 48  ;;  %p271_p3 = scmp.lt.s32.totalorder (!%p239_p2), %s566_s28, 31 }
   0xb   : > { %v295_v0 = vld [vmem:[%s734_s1] sm:$0x3]  ;;  %vm313_vm0 = vcmask 1040384   ;;  %vm314_vm1 = vcmask 1041408   ;;  %v628_v1 = vmov 65535   ;;  %s742_s28 = smov (!%p271_p3, %s566_s28), 31 }
   0xc   : > { %v315_v2 = vsel %vm313_vm0, 4294967295, %v628_v1  ;;  %s567_s29 = sshll.u32 %s742_s28, 3  ;;  %vm300_vm2 = vcmask 23552   ;;  %v601_v17 = vld [vmem:[%s736_s3 + $0x8] sm:$0xff]  ;;  %v600_v18 = vld [vmem:[%s736_s3] sm:$0xff]  ;;  %vm381_vm3 = vcmask 261120  }
   0xd   : > { %v316_v3 = vsel %vm314_vm1, %v315_v2, 0  ;;  %s274_s9 = scalar_lea.vmem %s733_s0, %s567_s29  ;;  %400 = vmatpush.bf16.msra.mxu1 %v601_v17  ;;  %604 = vmatpush.bf16.msra.mxu3 %v601_v17  ;;  %v617_v20 = vld [vmem:[%s735_s2] ss:$0 sm:$0xff]  ;;  %v603_v48 = vld [vmem:[%s738_s5 + $0x8] sm:$0xff]  ;;  %s280_s27 = scalar_lea.vmem %s740_s7, %s567_s29  ;;  %vm496_vm4 = vcmask 15360  }
   0xe   : > { %v318_v4 = vand.u32 %v316_v3, %v295_v0  ;;  %v283_v5 = vld [vmem:[%s274_s9] sm:$0xff]  ;;  %v284_v6 = vld [vmem:[%s274_s9 + $0x8] sm:$0xff]  ;;  %v285_v8 = vld [vmem:[%s274_s9 + $0x10] sm:$0xff]  ;;  %606 = vmatpush.bf16.msra.mxu2 %v603_v48 }
   0xf   : > { %v291_v7 = vpack.c.bf16 %v284_v6, %v283_v5  ;;  %v286_v9 = vld [vmem:[%s274_s9 + $0x18] sm:$0xff]  ;;  %v287_v11 = vld [vmem:[%s274_s9 + $0x20] sm:$0xff]  ;;  %v288_v12 = vld [vmem:[%s274_s9 + $0x28] sm:$0xff] }
  0x10   : > { %327 = vmatpush.bf16.msra.mxu0 %v318_v4  ;;  %v292_v10 = vpack.c.bf16 %v286_v9, %v285_v8  ;;  %v293_v13 = vpack.c.bf16 %v288_v12, %v287_v11  ;;  %v289_v14 = vld [vmem:[%s274_s9 + $0x30] sm:$0xff]  ;;  %v290_v15 = vld [vmem:[%s274_s9 + $0x38] sm:$0xff]  ;;  %v602_v49 = vld [vmem:[%s738_s5] sm:$0xff] }
  0x11   : > { %v294_v16 = vpack.c.bf16 %v290_v15, %v289_v14  ;;  %401 = vmatpush.bf16.msra.mxu1 %v600_v18  ;;  %605 = vmatpush.bf16.msra.mxu3 %v600_v18  ;;  %v618_v51 = vld [vmem:[%s737_s4] ss:$0 sm:$0xff] }
  0x12   : > { %607 = vmatpush.bf16.msra.mxu2 %v602_v49  ;;  %v619_v15 = vld [vmem:[%s739_s6] ss:$0 sm:$0xff] }
  0x13   : > { %570 = vmatmul.msk.bf16.vlgmr.msra.gmra.mxu0 %vm300_vm2, %v291_v7 }
  0x15   : > { %473 = vmatpush.bf16.msrb.mxu1 %v603_v48 }
  0x19   : > { %474 = vmatpush.bf16.msrb.mxu1 %v602_v49 }
  0x23   : > { %571 = vmatmul.msk.bf16.gmra.mxu0 %vm300_vm2, %v292_v10 }
  0x33   : > { %572 = vmatmul.msk.bf16.gmra.mxu0 %vm300_vm2, %v293_v13 }
  0x43   : > { %573 = vmatmul.msk.bf16.gmra.mxu0 %vm300_vm2, %v294_v16 }
  0x90   : > { %v329_v19 = vpop.f32.mrf.mxu0 }
  0x91   : > { %v330_v21 = vadd.f32 %v617_v20, %v329_v19 }
  0x93   : > { %v349_v24 = vmax.f32 %v330_v21, 0.0 }
  0x98   : > { %v331_v22 = vpop.f32.mrf.mxu0 }
  0x99   : > { %v332_v23 = vadd.f32 %v617_v20, %v331_v22 }
  0x9b   : > { %v350_v25 = vmax.f32 %v332_v23, 0.0 }
  0x9d   : > { %v357_v26 = vpack.c.bf16 %v350_v25, %v349_v24 }
  0x9f   : > { %582 = vmatmul.msk.bf16.vlgmr.msra.gmra.mxu1 %vm381_vm3, %v357_v26 }
  0xa0   : > { %v334_v27 = vpop.f32.mrf.mxu0 }
  0xa1   : > { %v335_v28 = vadd.f32 %v617_v20, %v334_v27 }
  0xa3   : > { %v351_v31 = vmax.f32 %v335_v28, 0.0 }
  0xa8   : > { %v336_v29 = vpop.f32.mrf.mxu0 }
  0xa9   : > { %v337_v30 = vadd.f32 %v617_v20, %v336_v29 }
  0xab   : > { %v352_v32 = vmax.f32 %v337_v30, 0.0 }
  0xad   : > { %v358_v33 = vpack.c.bf16 %v352_v32, %v351_v31 }
  0xaf   : > { %583 = vmatmul.msk.bf16.vlgmr.msra.gmra.mxu3 %vm381_vm3, %v358_v33 }
  0xb0   : > { %v339_v34 = vpop.f32.mrf.mxu0 }
  0xb1   : > { %v340_v35 = vadd.f32 %v617_v20, %v339_v34 }
  0xb3   : > { %v353_v38 = vmax.f32 %v340_v35, 0.0 }
  0xb8   : > { %v341_v36 = vpop.f32.mrf.mxu0 }
  0xb9   : > { %v342_v37 = vadd.f32 %v617_v20, %v341_v36 }
  0xbb   : > { %v354_v39 = vmax.f32 %v342_v37, 0.0 }
  0xbd   : > { %v359_v40 = vpack.c.bf16 %v354_v39, %v353_v38 }
  0xbf   : > { %584 = vmatmul.msk.bf16.gmra.mxu3 %vm381_vm3, %v359_v40 }
  0xc0   : > { %v344_v41 = vpop.f32.mrf.mxu0 }
  0xc1   : > { %v345_v42 = vadd.f32 %v617_v20, %v344_v41 }
  0xc3   : > { %v355_v45 = vmax.f32 %v345_v42, 0.0 }
  0xc8   : > { %v346_v43 = vpop.f32.mrf.mxu0 }
  0xc9   : > { %v347_v44 = vadd.f32 %v617_v20, %v346_v43 }
  0xcb   : > { %v356_v46 = vmax.f32 %v347_v44, 0.0 }
  0xcd   : > { %v360_v47 = vpack.c.bf16 %v356_v46, %v355_v45 }
  0xcf   : > { %585 = vmatmul.msk.bf16.gmra.mxu3 %vm381_vm3, %v360_v47 }
 0x11c   : > { %v403_v50 = vpop.f32.mrf.mxu1 }
 0x11d   : > { %v404_v52 = vadd.f32 %v618_v51, %v403_v50 }
 0x11f   : > { %v423_v55 = vmax.f32 %v404_v52, 0.0 }
 0x124   : > { %v405_v53 = vpop.f32.mrf.mxu1 }
 0x125   : > { %v406_v54 = vadd.f32 %v618_v51, %v405_v53 }
 0x127   : > { %v424_v56 = vmax.f32 %v406_v54, 0.0 }
 0x129   : > { %v431_v57 = vpack.c.bf16 %v424_v56, %v423_v55 }
 0x12b   : > { %594 = vmatmul.msk.bf16.vlgmr.msrb.gmra.mxu1 %vm381_vm3, %v431_v57 }
 0x132   : > { %v408_v58 = vpop.f32.mrf.mxu3 }
 0x133   : > { %v409_v59 = vadd.f32 %v618_v51, %v408_v58 }
 0x135   : > { %v425_v62 = vmax.f32 %v409_v59, 0.0 }
 0x13a   : > { %v410_v60 = vpop.f32.mrf.mxu3 }
 0x13b   : > { %v411_v61 = vadd.f32 %v618_v51, %v410_v60 }
 0x13d   : > { %v426_v63 = vmax.f32 %v411_v61, 0.0 }
 0x13f   : > { %v432_v0 = vpack.c.bf16 %v426_v63, %v425_v62 }
 0x141   : > { %595 = vmatmul.msk.bf16.vlgmr.msra.gmra.mxu2 %vm381_vm3, %v432_v0 }
 0x142   : > { %v413_v1 = vpop.f32.mrf.mxu3 }
 0x143   : > { %v414_v2 = vadd.f32 %v618_v51, %v413_v1 }
 0x145   : > { %v427_v5 = vmax.f32 %v414_v2, 0.0 }
 0x14a   : > { %v415_v3 = vpop.f32.mrf.mxu3 }
 0x14b   : > { %v416_v4 = vadd.f32 %v618_v51, %v415_v3 }
 0x14d   : > { %v428_v6 = vmax.f32 %v416_v4, 0.0 }
 0x14f   : > { %v433_v7 = vpack.c.bf16 %v428_v6, %v427_v5 }
 0x151   : > { %596 = vmatmul.msk.bf16.gmra.mxu2 %vm381_vm3, %v433_v7 }
 0x152   : > { %v418_v8 = vpop.f32.mrf.mxu3 }
 0x153   : > { %v419_v9 = vadd.f32 %v618_v51, %v418_v8 }
 0x155   : > { %v429_v12 = vmax.f32 %v419_v9, 0.0 }
 0x15a   : > { %v420_v10 = vpop.f32.mrf.mxu3 }
 0x15b   : > { %v421_v11 = vadd.f32 %v618_v51, %v420_v10 }
 0x15d   : > { %v430_v13 = vmax.f32 %v421_v11, 0.0 }
 0x15f   : > { %v434_v14 = vpack.c.bf16 %v430_v13, %v429_v12 }
 0x161   : > { %597 = vmatmul.msk.bf16.gmra.mxu2 %vm381_vm3, %v434_v14 }
 0x1a8   : > { %v476_v16 = vpop.f32.mrf.mxu1 }
 0x1a9   : > { %v477_v17 = vadd.f32 %v619_v15, %v476_v16 }
 0x1ab   : > { %497 = vst.msk [vmem:[%s280_s27] sm:$0xff] %vm496_vm4, %v477_v17 }
 0x1b0   : > { %v478_v18 = vpop.f32.mrf.mxu1 }
 0x1b1   : > { %v479_v19 = vadd.f32 %v619_v15, %v478_v18 }
 0x1b3   : > { %498 = vst.msk [vmem:[%s280_s27 + $0x8] sm:$0xff] %vm496_vm4, %v479_v19 }
 0x1c4   : > { %v481_v20 = vpop.f32.mrf.mxu2 }
 0x1c5   : > { %v482_v21 = vadd.f32 %v619_v15, %v481_v20 }
 0x1c7   : > { %499 = vst.msk [vmem:[%s280_s27 + $0x10] sm:$0xff] %vm496_vm4, %v482_v21 }
 0x1cc   : > { %v483_v22 = vpop.f32.mrf.mxu2 }
 0x1cd   : > { %v484_v23 = vadd.f32 %v619_v15, %v483_v22 }
 0x1cf   : > { %500 = vst.msk [vmem:[%s280_s27 + $0x18] sm:$0xff] %vm496_vm4, %v484_v23 }
 0x1d4   : > { %v486_v24 = vpop.f32.mrf.mxu2 }
 0x1d5   : > { %v487_v25 = vadd.f32 %v619_v15, %v486_v24 }
 0x1d7   : > { %501 = vst.msk [vmem:[%s280_s27 + $0x20] sm:$0xff] %vm496_vm4, %v487_v25 }
 0x1dc   : > { %v488_v26 = vpop.f32.mrf.mxu2 }
 0x1dd   : > { %v489_v27 = vadd.f32 %v619_v15, %v488_v26 }
 0x1df   : > { %502 = vst.msk [vmem:[%s280_s27 + $0x28] sm:$0xff] %vm496_vm4, %v489_v27 }
 0x1e4   : > { %v491_v28 = vpop.f32.mrf.mxu2 }
 0x1e5   : > { %v492_v29 = vadd.f32 %v619_v15, %v491_v28 }
 0x1e7   : > { %503 = vst.msk [vmem:[%s280_s27 + $0x30] sm:$0xff] %vm496_vm4, %v492_v29 }
 0x1ec   : > { %v493_v30 = vpop.f32.mrf.mxu2 }
 0x1ed   : > { %v494_v31 = vadd.f32 %v619_v15, %v493_v30 }
 0x1ef   : > { %504 = vst.msk [vmem:[%s280_s27 + $0x38] sm:$0xff] %vm496_vm4, %v494_v31 }
 0x1f0 PF: > { %s17_s24 = sadd.s32 1, %s626_s24  }
 0x1f1   : > { %p14_p4 = scmp.ge.s32.totalorder %s17_s24, 6  }
 0x1f3   :  { %16 = sbr.rel (!%p14_p4) target bundleno = 1 (0x1), region = 78 }

</bundles_post_ra>
